<compile_context>
chip_gen: v7x
topology: tpu7x:2x2x1
jax: 0.10.0
libtpu: 0.0.40
codegen_flags: <defaults>
</compile_context>

<pallas_src>
import functools

import numpy as np
import jax
import jax.numpy as jnp
from jax.experimental import pallas as pl
from jax.experimental.pallas import tpu as pltpu


def _mditre_kernel(x_ref, wts_ref, twn_ref, tws_ref, twstau_ref,
                   b_ref, c_ref, invden_ref, thr_ref, slp_ref,
                   za_ref, zas_ref, w_ref, bias_ref, out_ref,
                   *, k_thresh, k_slope, num_rules, num_det):
    """Fused per-sample MDITRE forward.

    x_ref      : (1, O, T)   sample's OTU x time abundances
    wts_ref    : (P, O)      spatial-aggregation weights, P = C*R (c-major)
    twn_ref    : (P, T)      normalized boxcar time weights (abundance)
    tws_ref    : (P, T)      unnormalized boxcar time weights (slope)
    twstau_ref : (P, T)      tws * tau
    b/c/invden : (P, 1)      sample-independent slope-regression terms
    thr/slp    : (P, 1)      threshold / slope parameters
    za/zas     : (P, 1)      binary-concrete gates for rules / rules_slope
    w_ref      : (R, 1)      weight * z_beta of the dense head
    bias_ref   : (1, 1)
    out_ref    : (1, 1, 1)   per-sample log-odds
    """
    sig = lambda v: 1.0 / (1.0 + jnp.exp(-v))

    # --- spatial aggregation (MXU): (P, O) @ (O, T) -> (P, T) ---
    x_agg = jnp.dot(wts_ref[...], x_ref[0], preferred_element_type=jnp.float32)

    # --- time aggregation: weighted mean + weighted LS slope (lane reduces) ---
    x_abun = jnp.sum(x_agg * twn_ref[...], axis=-1, keepdims=True)      # (P, 1)
    a = jnp.sum(x_agg * tws_ref[...], axis=-1, keepdims=True)           # (P, 1)
    d = jnp.sum(x_agg * twstau_ref[...], axis=-1, keepdims=True)        # (P, 1)
    x_slope = (a * b_ref[...] - c_ref[...] * d) * invden_ref[...]       # (P, 1)

    # --- threshold / slope gates (EUP) ---
    xt = sig((x_abun - thr_ref[...]) * k_thresh)
    xs = sig((x_slope - slp_ref[...]) * k_slope)

    # --- rules: soft AND over the C detectors of each rule ---
    # c-major layout p = c*R + r: detector c of every rule is the contiguous
    # row block [c*R, (c+1)*R), so the product over C is a block-multiply chain.
    fa = 1.0 - za_ref[...] * (1.0 - xt)                                  # (P, 1)
    fs = 1.0 - zas_ref[...] * (1.0 - xs)                                 # (P, 1)
    R = num_rules
    ra = fa[0:R, :]
    rs = fs[0:R, :]
    for c in range(1, num_det):
        ra = ra * fa[c * R:(c + 1) * R, :]
        rs = rs * fs[c * R:(c + 1) * R, :]

    # --- dense head: sum_r rule_abun * rule_slope * (w * z_beta) + bias ---
    val = jnp.sum(ra * rs * w_ref[...], axis=0, keepdims=True) + bias_ref[...]
    out_ref[...] = val[None]                                             # (1,1,1)


def mditre_forward(x, params, *, k_otu=1.0, k_time=1.0, k_thresh=1.0,
                   k_slope=1.0, k_alpha=1.0, k_beta=1.0):
    """x: (S, num_otus, num_time) f32.  Returns (S,) log-odds (eval forward)."""
    f32 = jnp.float32
    sig = jax.nn.sigmoid
    x = jnp.asarray(x, f32)
    S, O, T = x.shape
    eta = jnp.asarray(params['eta'], f32)
    R, C, E = eta.shape
    P = R * C

    # ---------- parameter-only precompute (tiny, no sample dimension) ----------
    dist = jnp.asarray(params['dist'], f32)                               # (O, E)
    d_rc_o = jnp.linalg.norm(eta[:, :, None, :] - dist[None, None, :, :], axis=-1)
    wts = sig((jnp.exp(jnp.asarray(params['kappa'], f32))[..., None] - d_rc_o)
              * k_otu)                                                    # (R, C, O)

    times = jnp.arange(T, dtype=f32)
    aa = sig(jnp.asarray(params['abun_a'], f32))[..., None]
    sa = sig(jnp.asarray(params['slope_a'], f32))[..., None]
    ab = sig(jnp.asarray(params['abun_b'], f32))[..., None]
    sb = sig(jnp.asarray(params['slope_b'], f32))[..., None]
    sigma, sigma_s = T * aa, T * sa
    mu = T * aa / 2.0 + (1.0 - aa) * T * ab
    mu_s = T * sa / 2.0 + (1.0 - sa) * T * sb

    def unitboxcar(m, l):
        dd = times - m
        return sig((dd + l / 2.0) * k_time) - sig((dd - l / 2.0) * k_time)

    twu = unitboxcar(mu, sigma)                                           # (R, C, T)
    tws = unitboxcar(mu_s, sigma_s)                                       # (R, C, T)
    twn = twu / (twu.sum(-1, keepdims=True) + 1e-8)
    tau = times - mu_s
    tws_tau = tws * tau
    b_rc = tws_tau.sum(-1)
    c_rc = tws.sum(-1)
    e_rc = (tws_tau * tau).sum(-1)
    invden = 1.0 / (b_rc * b_rc - e_rc * c_rc + 1e-8)

    # binary-concrete gates (deterministic eval path)
    za = sig(jnp.asarray(params['alpha'], f32) * k_alpha)                 # (R, C)
    zas = sig(jnp.asarray(params['alpha_slope'], f32) * k_alpha)          # (R, C)
    zb = sig(jnp.asarray(params['beta'], f32) * k_beta)                   # (R,)
    w_eff = (jnp.asarray(params['w'], f32)[0] * zb).reshape(R, 1)         # (R, 1)
    bias = jnp.asarray(params['bias'], f32).reshape(1, 1)

    # c-major flattening p = c*R + r
    def cm2(a):
        return jnp.transpose(jnp.asarray(a, f32), (1, 0)).reshape(P, 1)

    def cm3(a):
        return jnp.transpose(jnp.asarray(a, f32), (1, 0, 2)).reshape(P, -1)

    wts_p = cm3(wts)                                                      # (P, O)
    twn_p, tws_p, twstau_p = cm3(twn), cm3(tws), cm3(tws_tau)             # (P, T)
    b_p, c_p, invden_p = cm2(b_rc), cm2(c_rc), cm2(invden)                # (P, 1)
    thr_p, slp_p = cm2(params['thresh']), cm2(params['slope'])
    za_p, zas_p = cm2(za), cm2(zas)

    kernel = functools.partial(_mditre_kernel, k_thresh=float(k_thresh),
                               k_slope=float(k_slope), num_rules=R, num_det=C)

    const2 = lambda s: (0, 0)
    out = pl.pallas_call(
        kernel,
        out_shape=jax.ShapeDtypeStruct((S, 1, 1), f32),
        grid=(S,),
        in_specs=[
            pl.BlockSpec((1, O, T), lambda s: (s, 0, 0)),   # x, streamed per sample
            pl.BlockSpec((P, O), const2),                   # spatial weights (resident)
            pl.BlockSpec((P, T), const2),                   # normalized time weights
            pl.BlockSpec((P, T), const2),                   # slope time weights
            pl.BlockSpec((P, T), const2),                   # slope time weights * tau
            pl.BlockSpec((P, 1), const2),                   # b
            pl.BlockSpec((P, 1), const2),                   # c
            pl.BlockSpec((P, 1), const2),                   # 1 / den
            pl.BlockSpec((P, 1), const2),                   # thresh
            pl.BlockSpec((P, 1), const2),                   # slope
            pl.BlockSpec((P, 1), const2),                   # z_alpha (rules)
            pl.BlockSpec((P, 1), const2),                   # z_alpha (rules_slope)
            pl.BlockSpec((R, 1), const2),                   # w * z_beta
            pl.BlockSpec((1, 1), const2),                   # bias
        ],
        out_specs=pl.BlockSpec((1, 1, 1), lambda s: (s, 0, 0)),
        compiler_params=pltpu.CompilerParams(
            dimension_semantics=("parallel",),
        ),
    )(x, wts_p, twn_p, tws_p, twstau_p, b_p, c_p, invden_p,
      thr_p, slp_p, za_p, zas_p, w_eff, bias)

    return out.reshape(S)


def mditre_reference(x, params, *, k_otu=1.0, k_time=1.0, k_thresh=1.0,
                     k_slope=1.0, k_alpha=1.0, k_beta=1.0):
    """Pure-JAX transcription of the PyTorch eval forward (use_noise=False)."""
    sig = jax.nn.sigmoid
    x = jnp.asarray(x, jnp.float32)
    S, O, T = x.shape
    eta, dist = params['eta'], params['dist']
    d = jnp.linalg.norm(eta[:, :, None, :] - dist[None, None, :, :], axis=-1)
    wts = sig((jnp.exp(params['kappa'])[..., None] - d) * k_otu)
    xa = jnp.einsum('kij,sjt->skit', wts, x)                              # (S,R,C,T)

    times = jnp.arange(T, dtype=jnp.float32)
    aa = sig(params['abun_a'])[..., None]
    sa = sig(params['slope_a'])[..., None]
    ab = sig(params['abun_b'])[..., None]
    sb = sig(params['slope_b'])[..., None]
    sigma, sigma_s = T * aa, T * sa
    mu = T * aa / 2.0 + (1.0 - aa) * T * ab
    mu_s = T * sa / 2.0 + (1.0 - sa) * T * sb

    def ubc(m, l):
        dd = times - m
        return sig((dd + l / 2.0) * k_time) - sig((dd - l / 2.0) * k_time)

    twu, tws = ubc(mu, sigma), ubc(mu_s, sigma_s)
    tw = twu / (twu.sum(-1, keepdims=True) + 1e-8)
    x_abun = (xa * tw).sum(-1)
    tau = times - mu_s
    a = (tws * xa).sum(-1)
    b = (tws * tau).sum(-1)
    c = tws.sum(-1)
    dd = (tws * xa * tau).sum(-1)
    e = (tws * tau ** 2).sum(-1)
    x_slope = (a * b - c * dd) / (b ** 2 - e * c + 1e-8)

    xt = sig((x_abun - params['thresh']) * k_thresh)
    xs = sig((x_slope - params['slope']) * k_slope)
    za = sig(params['alpha'] * k_alpha)
    zas = sig(params['alpha_slope'] * k_alpha)
    r_ab = jnp.prod(1.0 - za * (1.0 - xt), axis=-1)                       # (S, R)
    r_sl = jnp.prod(1.0 - zas * (1.0 - xs), axis=-1)                      # (S, R)

    zb = sig(params['beta'] * k_beta)
    return (r_ab * r_sl) @ (params['w'][0] * zb) + params['bias'][0]      # (S,)


if __name__ == "__main__":
    # Small deterministic configuration.
    S, R, C, O, T, E = 2, 4, 4, 16, 8, 4

    key = jax.random.PRNGKey(0)
    keys = jax.random.split(key, 16)
    f32 = jnp.float32

    params = {
        'eta':         jax.random.normal(keys[0], (R, C, E), dtype=f32),
        'kappa':       jax.random.normal(keys[1], (R, C), dtype=f32) * 0.5,
        'dist':        jax.random.uniform(keys[2], (O, E), dtype=f32),
        'abun_a':      jax.random.normal(keys[3], (R, C), dtype=f32),
        'abun_b':      jax.random.normal(keys[4], (R, C), dtype=f32),
        'slope_a':     jax.random.normal(keys[5], (R, C), dtype=f32),
        'slope_b':     jax.random.normal(keys[6], (R, C), dtype=f32),
        'thresh':      jax.random.normal(keys[7], (R, C), dtype=f32) * 0.5,
        'slope':       jax.random.normal(keys[8], (R, C), dtype=f32) * 0.5,
        'alpha':       jax.random.normal(keys[9], (R, C), dtype=f32),
        'alpha_slope': jax.random.normal(keys[10], (R, C), dtype=f32),
        'w':           jax.random.normal(keys[11], (1, R), dtype=f32),
        'bias':        jax.random.normal(keys[12], (1,), dtype=f32),
        'beta':        jax.random.normal(keys[13], (R,), dtype=f32),
    }
    x = jax.random.uniform(keys[14], (S, O, T), dtype=f32)

    fwd = jax.jit(lambda xx, pp: mditre_forward(xx, pp))
    out = jax.block_until_ready(fwd(x, params))

    ref = mditre_reference(x, params)

    assert out.shape == (S,)
    np.testing.assert_allclose(np.asarray(out), np.asarray(ref),
                               rtol=1e-3, atol=1e-4)
    print("KERNEL_OK")
</pallas_src>

<mosaic_0001>
module attributes {stable_mosaic.version = 11 : i64} {
  func.func @_mditre_kernel(%arg0: i32, %arg1: memref<1x16x8xf32, #tpu.memory_space<vmem>>, %arg2: memref<16x16xf32, #tpu.memory_space<vmem>>, %arg3: memref<16x8xf32, #tpu.memory_space<vmem>>, %arg4: memref<16x8xf32, #tpu.memory_space<vmem>>, %arg5: memref<16x8xf32, #tpu.memory_space<vmem>>, %arg6: memref<16x1xf32, #tpu.memory_space<vmem>>, %arg7: memref<16x1xf32, #tpu.memory_space<vmem>>, %arg8: memref<16x1xf32, #tpu.memory_space<vmem>>, %arg9: memref<16x1xf32, #tpu.memory_space<vmem>>, %arg10: memref<16x1xf32, #tpu.memory_space<vmem>>, %arg11: memref<16x1xf32, #tpu.memory_space<vmem>>, %arg12: memref<16x1xf32, #tpu.memory_space<vmem>>, %arg13: memref<4x1xf32, #tpu.memory_space<vmem>>, %arg14: memref<1x1xf32, #tpu.memory_space<vmem>>, %arg15: memref<1x1x1xf32, #tpu.memory_space<vmem>>) attributes {dimension_semantics = [#tpu.dimension_semantics<parallel>], iteration_bounds = array<i64: 2>, scalar_prefetch = 0 : i64, scratch_operands = 0 : i64, tpu.core_type = #tpu.core_type<tc>, window_params = [{transform_indices = @transform_0, window_bounds = array<i64: 1, 16, 8>}, {pipeline_mode = #tpu.pipeline_mode<synchronous>, transform_indices = @transform_1, window_bounds = array<i64: 16, 16>}, {pipeline_mode = #tpu.pipeline_mode<synchronous>, transform_indices = @transform_2, window_bounds = array<i64: 16, 8>}, {pipeline_mode = #tpu.pipeline_mode<synchronous>, transform_indices = @transform_3, window_bounds = array<i64: 16, 8>}, {pipeline_mode = #tpu.pipeline_mode<synchronous>, transform_indices = @transform_4, window_bounds = array<i64: 16, 8>}, {pipeline_mode = #tpu.pipeline_mode<synchronous>, transform_indices = @transform_5, window_bounds = array<i64: 16, 1>}, {pipeline_mode = #tpu.pipeline_mode<synchronous>, transform_indices = @transform_6, window_bounds = array<i64: 16, 1>}, {pipeline_mode = #tpu.pipeline_mode<synchronous>, transform_indices = @transform_7, window_bounds = array<i64: 16, 1>}, {pipeline_mode = #tpu.pipeline_mode<synchronous>, transform_indices = @transform_8, window_bounds = array<i64: 16, 1>}, {pipeline_mode = #tpu.pipeline_mode<synchronous>, transform_indices = @transform_9, window_bounds = array<i64: 16, 1>}, {pipeline_mode = #tpu.pipeline_mode<synchronous>, transform_indices = @transform_10, window_bounds = array<i64: 16, 1>}, {pipeline_mode = #tpu.pipeline_mode<synchronous>, transform_indices = @transform_11, window_bounds = array<i64: 16, 1>}, {pipeline_mode = #tpu.pipeline_mode<synchronous>, transform_indices = @transform_12, window_bounds = array<i64: 4, 1>}, {pipeline_mode = #tpu.pipeline_mode<synchronous>, transform_indices = @transform_13, window_bounds = array<i64: 1, 1>}, {transform_indices = @transform_14, window_bounds = array<i64: 1, 1, 1>}]} {
    %c0 = arith.constant 0 : index
    %c0_0 = arith.constant 0 : index
    %0 = vector.load %arg2[%c0, %c0_0] : memref<16x16xf32, #tpu.memory_space<vmem>>, vector<16x16xf32>
    %c0_1 = arith.constant 0 : index
    %c0_2 = arith.constant 0 : index
    %c0_3 = arith.constant 0 : index
    %1 = vector.load %arg1[%c0_1, %c0_2, %c0_3] : memref<1x16x8xf32, #tpu.memory_space<vmem>>, vector<1x16x8xf32>
    %2 = vector.shape_cast %1 : vector<1x16x8xf32> to vector<16x8xf32>
    %cst = arith.constant dense<0.000000e+00> : vector<16x8xf32>
    %3 = tpu.matmul %0, %2, %cst {dimension_numbers = #tpu.dot_dimension_numbers<[1], [0], [0], [1], [0, 0, 1, 1], [], []>} : vector<16x16xf32>, vector<16x8xf32>, vector<16x8xf32> -> vector<16x8xf32>
    %c0_4 = arith.constant 0 : index
    %c0_5 = arith.constant 0 : index
    %4 = vector.load %arg3[%c0_4, %c0_5] : memref<16x8xf32, #tpu.memory_space<vmem>>, vector<16x8xf32>
    %5 = arith.mulf %3, %4 : vector<16x8xf32>
    %cst_6 = arith.constant dense<0.000000e+00> : vector<16xf32>
    %6 = vector.multi_reduction <add>, %5, %cst_6 [1] : vector<16x8xf32> to vector<16xf32>
    %7 = vector.shape_cast %6 : vector<16xf32> to vector<16x1xf32>
    %c0_7 = arith.constant 0 : index
    %c0_8 = arith.constant 0 : index
    %8 = vector.load %arg4[%c0_7, %c0_8] : memref<16x8xf32, #tpu.memory_space<vmem>>, vector<16x8xf32>
    %9 = arith.mulf %3, %8 : vector<16x8xf32>
    %cst_9 = arith.constant dense<0.000000e+00> : vector<16xf32>
    %10 = vector.multi_reduction <add>, %9, %cst_9 [1] : vector<16x8xf32> to vector<16xf32>
    %11 = vector.shape_cast %10 : vector<16xf32> to vector<16x1xf32>
    %c0_10 = arith.constant 0 : index
    %c0_11 = arith.constant 0 : index
    %12 = vector.load %arg5[%c0_10, %c0_11] : memref<16x8xf32, #tpu.memory_space<vmem>>, vector<16x8xf32>
    %13 = arith.mulf %3, %12 : vector<16x8xf32>
    %cst_12 = arith.constant dense<0.000000e+00> : vector<16xf32>
    %14 = vector.multi_reduction <add>, %13, %cst_12 [1] : vector<16x8xf32> to vector<16xf32>
    %15 = vector.shape_cast %14 : vector<16xf32> to vector<16x1xf32>
    %c0_13 = arith.constant 0 : index
    %c0_14 = arith.constant 0 : index
    %16 = vector.load %arg6[%c0_13, %c0_14] : memref<16x1xf32, #tpu.memory_space<vmem>>, vector<16x1xf32>
    %17 = arith.mulf %11, %16 : vector<16x1xf32>
    %c0_15 = arith.constant 0 : index
    %c0_16 = arith.constant 0 : index
    %18 = vector.load %arg7[%c0_15, %c0_16] : memref<16x1xf32, #tpu.memory_space<vmem>>, vector<16x1xf32>
    %19 = arith.mulf %18, %15 : vector<16x1xf32>
    %20 = arith.subf %17, %19 : vector<16x1xf32>
    %c0_17 = arith.constant 0 : index
    %c0_18 = arith.constant 0 : index
    %21 = vector.load %arg8[%c0_17, %c0_18] : memref<16x1xf32, #tpu.memory_space<vmem>>, vector<16x1xf32>
    %22 = arith.mulf %20, %21 : vector<16x1xf32>
    %c0_19 = arith.constant 0 : index
    %c0_20 = arith.constant 0 : index
    %23 = vector.load %arg9[%c0_19, %c0_20] : memref<16x1xf32, #tpu.memory_space<vmem>>, vector<16x1xf32>
    %24 = arith.subf %7, %23 : vector<16x1xf32>
    %cst_21 = arith.constant 1.000000e+00 : f32
    %25 = vector.broadcast %cst_21 : f32 to vector<16x1xf32>
    %26 = arith.mulf %24, %25 : vector<16x1xf32>
    %cst_22 = arith.constant 0.000000e+00 : f32
    %27 = vector.broadcast %cst_22 : f32 to vector<16x1xf32>
    %28 = arith.subf %27, %26 : vector<16x1xf32>
    %29 = math.exp %28 : vector<16x1xf32>
    %cst_23 = arith.constant 1.000000e+00 : f32
    %30 = vector.broadcast %cst_23 : f32 to vector<16x1xf32>
    %31 = arith.addf %30, %29 : vector<16x1xf32>
    %cst_24 = arith.constant 1.000000e+00 : f32
    %32 = vector.broadcast %cst_24 : f32 to vector<16x1xf32>
    %33 = arith.divf %32, %31 : vector<16x1xf32>
    %c0_25 = arith.constant 0 : index
    %c0_26 = arith.constant 0 : index
    %34 = vector.load %arg10[%c0_25, %c0_26] : memref<16x1xf32, #tpu.memory_space<vmem>>, vector<16x1xf32>
    %35 = arith.subf %22, %34 : vector<16x1xf32>
    %cst_27 = arith.constant 1.000000e+00 : f32
    %36 = vector.broadcast %cst_27 : f32 to vector<16x1xf32>
    %37 = arith.mulf %35, %36 : vector<16x1xf32>
    %cst_28 = arith.constant 0.000000e+00 : f32
    %38 = vector.broadcast %cst_28 : f32 to vector<16x1xf32>
    %39 = arith.subf %38, %37 : vector<16x1xf32>
    %40 = math.exp %39 : vector<16x1xf32>
    %cst_29 = arith.constant 1.000000e+00 : f32
    %41 = vector.broadcast %cst_29 : f32 to vector<16x1xf32>
    %42 = arith.addf %41, %40 : vector<16x1xf32>
    %cst_30 = arith.constant 1.000000e+00 : f32
    %43 = vector.broadcast %cst_30 : f32 to vector<16x1xf32>
    %44 = arith.divf %43, %42 : vector<16x1xf32>
    %c0_31 = arith.constant 0 : index
    %c0_32 = arith.constant 0 : index
    %45 = vector.load %arg11[%c0_31, %c0_32] : memref<16x1xf32, #tpu.memory_space<vmem>>, vector<16x1xf32>
    %cst_33 = arith.constant 1.000000e+00 : f32
    %46 = vector.broadcast %cst_33 : f32 to vector<16x1xf32>
    %47 = arith.subf %46, %33 : vector<16x1xf32>
    %48 = arith.mulf %45, %47 : vector<16x1xf32>
    %cst_34 = arith.constant 1.000000e+00 : f32
    %49 = vector.broadcast %cst_34 : f32 to vector<16x1xf32>
    %50 = arith.subf %49, %48 : vector<16x1xf32>
    %c0_35 = arith.constant 0 : index
    %c0_36 = arith.constant 0 : index
    %51 = vector.load %arg12[%c0_35, %c0_36] : memref<16x1xf32, #tpu.memory_space<vmem>>, vector<16x1xf32>
    %cst_37 = arith.constant 1.000000e+00 : f32
    %52 = vector.broadcast %cst_37 : f32 to vector<16x1xf32>
    %53 = arith.subf %52, %44 : vector<16x1xf32>
    %54 = arith.mulf %51, %53 : vector<16x1xf32>
    %cst_38 = arith.constant 1.000000e+00 : f32
    %55 = vector.broadcast %cst_38 : f32 to vector<16x1xf32>
    %56 = arith.subf %55, %54 : vector<16x1xf32>
    %57 = vector.extract_strided_slice %50 {offsets = [0, 0], sizes = [4, 1], strides = [1, 1]} : vector<16x1xf32> to vector<4x1xf32>
    %58 = vector.extract_strided_slice %56 {offsets = [0, 0], sizes = [4, 1], strides = [1, 1]} : vector<16x1xf32> to vector<4x1xf32>
    %59 = vector.extract_strided_slice %50 {offsets = [4, 0], sizes = [4, 1], strides = [1, 1]} : vector<16x1xf32> to vector<4x1xf32>
    %60 = arith.mulf %57, %59 : vector<4x1xf32>
    %61 = vector.extract_strided_slice %56 {offsets = [4, 0], sizes = [4, 1], strides = [1, 1]} : vector<16x1xf32> to vector<4x1xf32>
    %62 = arith.mulf %58, %61 : vector<4x1xf32>
    %63 = vector.extract_strided_slice %50 {offsets = [8, 0], sizes = [4, 1], strides = [1, 1]} : vector<16x1xf32> to vector<4x1xf32>
    %64 = arith.mulf %60, %63 : vector<4x1xf32>
    %65 = vector.extract_strided_slice %56 {offsets = [8, 0], sizes = [4, 1], strides = [1, 1]} : vector<16x1xf32> to vector<4x1xf32>
    %66 = arith.mulf %62, %65 : vector<4x1xf32>
    %67 = vector.extract_strided_slice %50 {offsets = [12, 0], sizes = [4, 1], strides = [1, 1]} : vector<16x1xf32> to vector<4x1xf32>
    %68 = arith.mulf %64, %67 : vector<4x1xf32>
    %69 = vector.extract_strided_slice %56 {offsets = [12, 0], sizes = [4, 1], strides = [1, 1]} : vector<16x1xf32> to vector<4x1xf32>
    %70 = arith.mulf %66, %69 : vector<4x1xf32>
    %71 = arith.mulf %68, %70 : vector<4x1xf32>
    %c0_39 = arith.constant 0 : index
    %c0_40 = arith.constant 0 : index
    %72 = vector.load %arg13[%c0_39, %c0_40] : memref<4x1xf32, #tpu.memory_space<vmem>>, vector<4x1xf32>
    %73 = arith.mulf %71, %72 : vector<4x1xf32>
    %cst_41 = arith.constant dense<0.000000e+00> : vector<1xf32>
    %74 = vector.multi_reduction <add>, %73, %cst_41 [0] : vector<4x1xf32> to vector<1xf32>
    %75 = vector.shape_cast %74 : vector<1xf32> to vector<1x1xf32>
    %c0_42 = arith.constant 0 : index
    %c0_43 = arith.constant 0 : index
    %76 = vector.load %arg14[%c0_42, %c0_43] : memref<1x1xf32, #tpu.memory_space<vmem>>, vector<1x1xf32>
    %77 = arith.addf %75, %76 : vector<1x1xf32>
    %78 = vector.shape_cast %77 : vector<1x1xf32> to vector<1x1x1xf32>
    %c0_44 = arith.constant 0 : index
    %c0_45 = arith.constant 0 : index
    %c0_46 = arith.constant 0 : index
    %79 = vector.load %arg15[%c0_44, %c0_45, %c0_46] : memref<1x1x1xf32, #tpu.memory_space<vmem>>, vector<1x1x1xf32>
    tpu.vector_store %arg15[%c0_44, %c0_45, %c0_46], %78 {strides = array<i32>} : memref<1x1x1xf32, #tpu.memory_space<vmem>>, vector<1x1x1xf32>,
    return
  }
  func.func @transform_0(%arg0: i32) -> (i32, i32, i32) {
    %c0_i32 = arith.constant 0 : i32
    %c0_i32_0 = arith.constant 0 : i32
    %c0_i32_1 = arith.constant 0 : i32
    return %arg0, %c0_i32, %c0_i32_0 : i32, i32, i32
  }
  func.func @transform_1(%arg0: i32) -> (i32, i32) {
    %c0_i32 = arith.constant 0 : i32
    %c0_i32_0 = arith.constant 0 : i32
    %c0_i32_1 = arith.constant 0 : i32
    return %c0_i32, %c0_i32_0 : i32, i32
  }
  func.func @transform_2(%arg0: i32) -> (i32, i32) {
    %c0_i32 = arith.constant 0 : i32
    %c0_i32_0 = arith.constant 0 : i32
    %c0_i32_1 = arith.constant 0 : i32
    return %c0_i32, %c0_i32_0 : i32, i32
  }
  func.func @transform_3(%arg0: i32) -> (i32, i32) {
    %c0_i32 = arith.constant 0 : i32
    %c0_i32_0 = arith.constant 0 : i32
    %c0_i32_1 = arith.constant 0 : i32
    return %c0_i32, %c0_i32_0 : i32, i32
  }
  func.func @transform_4(%arg0: i32) -> (i32, i32) {
    %c0_i32 = arith.constant 0 : i32
    %c0_i32_0 = arith.constant 0 : i32
    %c0_i32_1 = arith.constant 0 : i32
    return %c0_i32, %c0_i32_0 : i32, i32
  }
  func.func @transform_5(%arg0: i32) -> (i32, i32) {
    %c0_i32 = arith.constant 0 : i32
    %c0_i32_0 = arith.constant 0 : i32
    %c0_i32_1 = arith.constant 0 : i32
    return %c0_i32, %c0_i32_0 : i32, i32
  }
  func.func @transform_6(%arg0: i32) -> (i32, i32) {
    %c0_i32 = arith.constant 0 : i32
    %c0_i32_0 = arith.constant 0 : i32
    %c0_i32_1 = arith.constant 0 : i32
    return %c0_i32, %c0_i32_0 : i32, i32
  }
  func.func @transform_7(%arg0: i32) -> (i32, i32) {
    %c0_i32 = arith.constant 0 : i32
    %c0_i32_0 = arith.constant 0 : i32
    %c0_i32_1 = arith.constant 0 : i32
    return %c0_i32, %c0_i32_0 : i32, i32
  }
  func.func @transform_8(%arg0: i32) -> (i32, i32) {
    %c0_i32 = arith.constant 0 : i32
    %c0_i32_0 = arith.constant 0 : i32
    %c0_i32_1 = arith.constant 0 : i32
    return %c0_i32, %c0_i32_0 : i32, i32
  }
  func.func @transform_9(%arg0: i32) -> (i32, i32) {
    %c0_i32 = arith.constant 0 : i32
    %c0_i32_0 = arith.constant 0 : i32
    %c0_i32_1 = arith.constant 0 : i32
    return %c0_i32, %c0_i32_0 : i32, i32
  }
  func.func @transform_10(%arg0: i32) -> (i32, i32) {
    %c0_i32 = arith.constant 0 : i32
    %c0_i32_0 = arith.constant 0 : i32
    %c0_i32_1 = arith.constant 0 : i32
    return %c0_i32, %c0_i32_0 : i32, i32
  }
  func.func @transform_11(%arg0: i32) -> (i32, i32) {
    %c0_i32 = arith.constant 0 : i32
    %c0_i32_0 = arith.constant 0 : i32
    %c0_i32_1 = arith.constant 0 : i32
    return %c0_i32, %c0_i32_0 : i32, i32
  }
  func.func @transform_12(%arg0: i32) -> (i32, i32) {
    %c0_i32 = arith.constant 0 : i32
    %c0_i32_0 = arith.constant 0 : i32
    %c0_i32_1 = arith.constant 0 : i32
    return %c0_i32, %c0_i32_0 : i32, i32
  }
  func.func @transform_13(%arg0: i32) -> (i32, i32) {
    %c0_i32 = arith.constant 0 : i32
    %c0_i32_0 = arith.constant 0 : i32
    %c0_i32_1 = arith.constant 0 : i32
    return %c0_i32, %c0_i32_0 : i32, i32
  }
  func.func @transform_14(%arg0: i32) -> (i32, i32, i32) {
    %c0_i32 = arith.constant 0 : i32
    %c0_i32_0 = arith.constant 0 : i32
    %c0_i32_1 = arith.constant 0 : i32
    return %arg0, %c0_i32, %c0_i32_0 : i32, i32, i32
  }
}

</mosaic_0001>

<bundles_post_ra>
// kernel: _lambda_.1
= control target key start
LH: loop header
LB: loop body
LE: loop exit
PB: predicated region body
PF: predicated region fallthrough
CT: control target
= control target key end

     0   :  { %s862_s15 = smov 0   ;;  %s958_s0 = inlined_call_operand.vmem [shape: f32[2,16,8], index: 0, kind: input, shape index: {}]   ;;  %s959_s1 = inlined_call_operand.vmem [shape: f32[16,16], index: 1, kind: input, shape index: {}]   ;;  %s960_s2 = inlined_call_operand.vmem [shape: f32[16,8], index: 2, kind: input, shape index: {}]   ;;  %s961_s3 = inlined_call_operand.vmem [shape: f32[16,8], index: 3, kind: input, shape index: {}]   ;;  %s962_s4 = inlined_call_operand.vmem [shape: f32[16,8], index: 4, kind: input, shape index: {}]   ;;  %s963_s5 = inlined_call_operand.vmem [shape: f32[16,1], index: 5, kind: input, shape index: {}]   ;;  %s964_s6 = inlined_call_operand.vmem [shape: f32[16,1], index: 6, kind: input, shape index: {}]   ;;  %s965_s7 = inlined_call_operand.vmem [shape: f32[16,1], index: 7, kind: input, shape index: {}]   ;;  %s966_s8 = inlined_call_operand.vmem [shape: f32[16,1], index: 8, kind: input, shape index: {}]   ;;  %s967_s9 = inlined_call_operand.vmem [shape: f32[16,1], index: 9, kind: input, shape index: {}]   ;;  %s968_s10 = inlined_call_operand.vmem [shape: f32[16,1], index: 10, kind: input, shape index: {}]   ;;  %s969_s11 = inlined_call_operand.vmem [shape: f32[16,1], index: 11, kind: input, shape index: {}]   ;;  %s970_s12 = inlined_call_operand.vmem [shape: f32[4,1], index: 12, kind: input, shape index: {}]   ;;  %s971_s13 = inlined_call_operand.<no memory space> [shape: f32[1,1], index: 13, kind: input, shape index: {}]   ;;  %s972_s14 = inlined_call_operand.vmem [shape: f32[2,1,1], index: 14, kind: output, shape index: {}]  }
   0x1   :  { %v19_v0 = vstv %s971_s13 }
   0x2   :  { %20 = vst [vmem:[#allocation2] sm:$0x1] %v19_v0 }
   0x3 LB: > { %s725_s16 = sadd.s32 4294967295, %s782_s15   ;;  %p729_p0 = scmp.ge.s32.totalorder %s782_s15, 1  ;;  %s782_s15 = sphi %s862_s15, %s26_s15  }
   0x4   : > { %p414_p1 = scmp.lt.s32.totalorder %s782_s15, 3 }
   0x6   : > { %p415_p2 = pnand %p729_p0, %p414_p1 }
   0x7   : > { %p458_p3 = scmp.lt.s32.totalorder (!%p415_p2), %s725_s16, 1  ;;  %v466_v1 = vld [vmem:[%s959_s1] sm:$0xff] (!%p415_p2)  ;;  %vm470_vm0 = vcmask (!%p415_p2), 130048   ;;  %v467_v5 = vld [vmem:[%s959_s1 + $0x8] sm:$0xff] (!%p415_p2)  ;;  %vm556_vm1 = vcmask (!%p415_p2), 64512   ;;  %vm666_vm2 = vcmask (!%p415_p2), 3072  }
   0x8   : > { %418 = sbr.rel (%p415_p2) target bundleno = 457 (0x1c9), region = 76  ;;  %745 = vmatprep.mubr.msk.f32.mxu0 (!%p415_p2), %vm470_vm0, %v466_v1  ;;  %v564_v6 = vld [vmem:[%s961_s3 + $0x8] sm:$0xff] (!%p415_p2)  ;;  %v563_v7 = vld [vmem:[%s961_s3] sm:$0xff] (!%p415_p2)  ;;  %vm676_vm3 = vcmask (!%p415_p2), 0  }
   0x9   : > { %v574_v9 = vld [vmem:[%s962_s4 + $0x8] sm:$0xff] (!%p415_p2)  ;;  %v573_v11 = vld [vmem:[%s962_s4] sm:$0xff] (!%p415_p2) }
   0xa   : > { %v553_v18 = vld [vmem:[%s960_s2 + $0x8] sm:$0xff] (!%p415_p2)  ;;  %v552_v19 = vld [vmem:[%s960_s2] sm:$0xff] (!%p415_p2) }
   0xb   : > { %v584_v28 = vld [vmem:[%s963_s5 + $0x8] sm:$0xff] (!%p415_p2)  ;;  %v583_v30 = vld [vmem:[%s963_s5] sm:$0xff] (!%p415_p2) }
   0xc   : > { %v588_v29 = vld [vmem:[%s964_s6 + $0x8] sm:$0xff] (!%p415_p2)  ;;  %v587_v31 = vld [vmem:[%s964_s6] sm:$0xff] (!%p415_p2) }
   0xd   : > { %v594_v37 = vld [vmem:[%s965_s7 + $0x8] sm:$0xff] (!%p415_p2)  ;;  %v593_v41 = vld [vmem:[%s965_s7] sm:$0xff] (!%p415_p2) }
   0xe   : > { %v598_v39 = vld [vmem:[%s966_s8 + $0x8] sm:$0xff] (!%p415_p2)  ;;  %v597_v42 = vld [vmem:[%s966_s8] sm:$0xff] (!%p415_p2) }
   0xf   : > { %s974_s16 = smov (!%p458_p3, %s725_s16), 1  ;;  %v614_v43 = vld [vmem:[%s967_s9 + $0x8] sm:$0xff]  ;;  %v613_v47 = vld [vmem:[%s967_s9] sm:$0xff] }
  0x10   : > { %s736_s13 = sshll.u32 %s974_s16, 4  ;;  %s465_s23 = scalar_lea.vmem %s972_s14, %s974_s16 }
  0x11   : > { %s462_s21 = scalar_lea.vmem %s958_s0, %s736_s13 }
  0x12   : > { %v468_v2 = vld [vmem:[%s462_s21] sm:$0xff]  ;;  %v469_v3 = vld [vmem:[%s462_s21 + $0x8] sm:$0xff] }
  0x13   : > { %v748_v4 = vpack.c.bf16 %v469_v3, %v468_v2 }
  0x15   : > { %749 = vmatprep.subr.bf16.mxu0 %v748_v4 }
  0x16   : > { %751 = vmatpush3.bf16.msra.mxu0 %v748_v4 }
  0x19   : > { %746 = vmatmul.mubr.msk.f32.vlgmr.msra.gmra.mrb[0].mxu0 %vm470_vm0, %v467_v5 }
  0xec   : > { %v747_v8 = vpop.f32.mrb[0].mxu0 }
  0xed   : > { %v543_v10 = vpop.f32.mrb[1].mxu0  ;;  %v566_v12 = vmul.f32 %v747_v8, %v564_v6  ;;  %v576_v15 = vmul.f32 %v747_v8, %v574_v9  ;;  %v555_v21 = vmul.f32 %v747_v8, %v553_v18  ;;  %v629_v8 = vld [vmem:[%s968_s10] sm:$0xff] }
  0xee   : > { %v565_v13 = vmul.f32 %v563_v7, %v543_v10  ;;  %v575_v16 = vmul.f32 %v573_v11, %v543_v10  ;;  %v554_v22 = vmul.f32 %v552_v19, %v543_v10 }
  0xef   : > { %v570_v14 = vsel %vm556_vm1, %v566_v12, 0.0  ;;  %v580_v20 = vsel %vm556_vm1, %v576_v15, 0.0  ;;  %v560_v24 = vsel %vm556_vm1, %v555_v21, 0.0  ;;  %v637_v15 = vld [vmem:[%s969_s11] sm:$0xff] }
  0xf0   : > { %571 = vadd.xlane.f32.xlu1 %v570_v14  ;;  %v567_v17 = vsel %vm556_vm1, %v565_v13, 0.0  ;;  %v577_v23 = vsel %vm556_vm1, %v575_v16, 0.0  ;;  %v557_v25 = vsel %vm556_vm1, %v554_v22, 0.0  ;;  %v638_v13 = vld [vmem:[%s969_s11 + $0x8] sm:$0xff] }
  0xf1   : > { %568 = vadd.xlane.f32.xlu0 %v567_v17  ;;  %v630_v16 = vld [vmem:[%s968_s10 + $0x8] sm:$0xff] }
  0xf4   : > { %581 = vadd.xlane.f32.xlu1 %v580_v20 }
  0xf5   : > { %578 = vadd.xlane.f32.xlu0 %v577_v23 }
  0xf8   : > { %561 = vadd.xlane.f32.xlu1 %v560_v24 }
  0xf9   : > { %558 = vadd.xlane.f32.xlu0 %v557_v25 }
 0x17d   : > { %v572_v26 = vpop.xlane.xlu1 %571 }
 0x17e   : > { %v569_v27 = vpop.xlane.xlu0 %568  ;;  %v586_v33 = vmul.f32 %v584_v28, %v572_v26 }
 0x17f   : > { %v585_v36 = vmul.f32 %v583_v30, %v569_v27 }
 0x181   : > { %v582_v32 = vpop.xlane.xlu1 %581 }
 0x182   : > { %v590_v34 = vmul.f32 %v588_v29, %v582_v32  ;;  %v579_v35 = vpop.xlane.xlu0 %578 }
 0x183   : > { %v589_v38 = vmul.f32 %v587_v31, %v579_v35 }
 0x184   : > { %v592_v40 = vsub.f32 %v586_v33, %v590_v34 }
 0x185   : > { %v591_v44 = vsub.f32 %v585_v36, %v589_v38  ;;  %v562_v45 = vpop.xlane.xlu1 %561  ;;  %v664_v36 = vld [vmem:[%s970_s12] sm:$0xf] }
 0x186   : > { %v596_v46 = vmul.f32 %v594_v37, %v592_v40  ;;  %v600_v48 = vsub.f32 %v562_v45, %v598_v39  ;;  %v559_v49 = vpop.xlane.xlu0 %558  ;;  %v674_v45 = vld [vmem:[#allocation2] sm:$0x1] }
 0x187   : > { %v595_v50 = vmul.f32 %v593_v41, %v591_v44  ;;  %v599_v51 = vsub.f32 %v559_v49, %v597_v42 }
 0x188   : > { %v616_v52 = vsub.f32 %v596_v46, %v614_v43  ;;  %v602_v53 = vsub.f32 0.0, %v600_v48 }
 0x189   : > { %v615_v54 = vsub.f32 %v595_v50, %v613_v47  ;;  %v601_v55 = vsub.f32 0.0, %v599_v51 }
 0x18a   : > { %v618_v56 = vsub.f32 0.0, %v616_v52  ;;  %v605_v57 = vmul.f32 1.442695, %v602_v53 }
 0x18b   : > { %v617_v58 = vsub.f32 0.0, %v615_v54  ;;  %v603_v59 = vmul.f32 1.442695, %v601_v55 }
 0x18c   : > { %v621_v60 = vmul.f32 1.442695, %v618_v56  ;;  %760 = vpow2.f32 %v605_v57 }
 0x18d   : > { %v619_v61 = vmul.f32 1.442695, %v617_v58  ;;  %762 = vpow2.f32 %v603_v59 }
 0x18e   : > { %764 = vpow2.f32 %v621_v60 }
 0x18f   : > { %766 = vpow2.f32 %v619_v61 }
 0x196   : > { %v761_v62 = vpop.eup %760 }
 0x197   : > { %v763_v63 = vpop.eup %762  ;;  %v608_v0 = vadd.f32 1.0, %v761_v62 }
 0x198   : > { %v765_v1 = vpop.eup %764  ;;  %v607_v2 = vadd.f32 1.0, %v763_v63 }
 0x199   : > { %v767_v3 = vpop.eup %766  ;;  %v624_v4 = vadd.f32 1.0, %v765_v1  ;;  %768 = vrcp.f32 %v608_v0 }
 0x19a   : > { %v623_v5 = vadd.f32 1.0, %v767_v3  ;;  %770 = vrcp.f32 %v607_v2 }
 0x19b   : > { %772 = vrcp.f32 %v624_v4 }
 0x19c   : > { %774 = vrcp.f32 %v623_v5 }
 0x1a3   : > { %v769_v6 = vpop.eup %768 }
 0x1a4   : > { %v771_v7 = vpop.eup %770  ;;  %v632_v10 = vsub.f32 1.0, %v769_v6 }
 0x1a5   : > { %v773_v9 = vpop.eup %772  ;;  %v631_v11 = vsub.f32 1.0, %v771_v7 }
 0x1a6   : > { %v775_v12 = vpop.eup %774  ;;  %v640_v14 = vsub.f32 1.0, %v773_v9  ;;  %v634_v21 = vmul.f32 %v632_v10, %v630_v16 }
 0x1a7   : > { %v639_v17 = vsub.f32 1.0, %v775_v12  ;;  %v633_v18 = vmul.f32 %v631_v11, %v629_v8 }
 0x1a8   : > { %v642_v19 = vmul.f32 %v640_v14, %v638_v13  ;;  %v636_v27 = vsub.f32 1.0, %v634_v21 }
 0x1a9   : > { %v641_v20 = vmul.f32 %v639_v17, %v637_v15  ;;  %v635_v22 = vsub.f32 1.0, %v633_v18 }
 0x1aa   : > { %v644_v25 = vsub.f32 1.0, %v642_v19  ;;  %v656_v33 = vrot.slane %v636_v27, 4 }
 0x1ab   : > { %v643_v23 = vsub.f32 1.0, %v641_v20  ;;  %v646_v24 = vrot.slane %v635_v22, 4 }
 0x1ac   : > { %v660_v31 = vrot.slane %v644_v25, 4 }
 0x1ad   : > { %v650_v26 = vrot.slane %v643_v23, 4  ;;  %v648_v28 = vmul.f32 %v646_v24, %v635_v22 }
 0x1af   : > { %v652_v29 = vmul.f32 %v650_v26, %v643_v23  ;;  %v653_v30 = vmul.f32 %v648_v28, %v636_v27 }
 0x1b1   : > { %v654_v32 = vmul.f32 %v652_v29, %v644_v25  ;;  %v658_v35 = vmul.f32 %v656_v33, %v653_v30 }
 0x1b3   : > { %v662_v34 = vmul.f32 %v660_v31, %v654_v32 }
 0x1b5   : > { %v663_v37 = vmul.f32 %v662_v34, %v658_v35 }
 0x1b7   : > { %v665_v38 = vmul.f32 %v664_v36, %v663_v37 }
 0x1b9   : > { %v667_v39 = vsel %vm666_vm2, %v665_v38, 0.0 }
 0x1ba   : > { %v668_v40 = vrot.slane %v667_v39, 4 }
 0x1bc   : > { %v669_v41 = vadd.f32 %v668_v40, %v667_v39 }
 0x1be   : > { %v670_v42 = vrot.slane %v669_v41, 2 }
 0x1c0   : > { %v671_v43 = vadd.f32 %v670_v42, %v669_v41 }
 0x1c2   : > { %v672_v44 = vrot.slane %v671_v43, 1 }
 0x1c4   : > { %v673_v46 = vadd.f32 %v672_v44, %v671_v43 }
 0x1c6   : > { %v675_v47 = vadd.f32 %v674_v45, %v673_v46 }
 0x1c8   : > { %677 = vst.msk [vmem:[%s465_s23] sm:$0x1] %vm676_vm3, %v675_v47 }
 0x1c9 PF: > { %s26_s15 = sadd.s32 1, %s782_s15  }
 0x1ca   : > { %p23_p4 = scmp.ge.s32.totalorder %s26_s15, 4  }
 0x1cc   :  { %25 = sbr.rel (!%p23_p4) target bundleno = 3 (0x3), region = 106 }

</bundles_post_ra>
